<compile_context>
chip_gen: v7x
topology: tpu7x:2x2x1
jax: 0.10.0
libtpu: 0.0.40
codegen_flags: <defaults>
</compile_context>

<pallas_src>
import jax
import jax.numpy as jnp
from jax import lax
from jax.experimental import pallas as pl
from jax.experimental.pallas import tpu as pltpu


def att_head_kernel(x_ref, w1_ref, b1_ref, w2_ref, b2_ref, o_ref):
    # x_ref : (tm, D)   input row tile
    # w1_ref: (A, D)    fc1.weight (PyTorch layout)
    # b1_ref: (A, 1)    fc1.bias as a column
    # w2_ref: (A, 1)    fc2.weight^T as a column
    # b2_ref: (1,)      fc2.bias (SMEM scalar)
    # o_ref : (1, tm)   lane-dense output row

    # fc1 in transposed orientation: h[a, m] = sum_d W1[a, d] * x[m, d]   (MXU)
    h = lax.dot_general(
        w1_ref[...], x_ref[...],
        dimension_numbers=(((1,), (1,)), ((), ())),
        preferred_element_type=jnp.float32,
    )                                                  # (A, tm), f32 accumulate
    h = jnp.maximum(h + b1_ref[...], 0.0)              # bias (lane bcast) + ReLU

    # fc2: VPU multiply + sublane reduction -> stays lane-major
    logit = jnp.sum(h * w2_ref[...], axis=0, keepdims=True)   # (1, tm)
    logit = logit + b2_ref[0]                                  # SMEM scalar

    o_ref[...] = jax.nn.sigmoid(logit).astype(o_ref.dtype)


def _round_up(n: int, m: int) -> int:
    return ((n + m - 1) // m) * m


def att_head(x, w1, b1, w2, b2, *, tm=1024):
    """CHIEF Att_Head forward.

    x : (N, FEATURE_DIM)
    w1: (ATT_IM_DIM, FEATURE_DIM)  -- fc1.weight (PyTorch layout)
    b1: (ATT_IM_DIM,)              -- fc1.bias
    w2: (1, ATT_IM_DIM)            -- fc2.weight
    b2: (1,)                       -- fc2.bias
    Returns (N, 1).
    """
    N, D = x.shape
    A = w1.shape[0]

    # Row tile: a multiple of 128 (lane-dense output blocks), as large as useful.
    tm_eff = _round_up(min(tm, _round_up(N, 128)), 128)
    n_pad = _round_up(N, tm_eff)
    if n_pad != N:
        x = jnp.pad(x, ((0, n_pad - N), (0, 0)))

    b1_col = b1.reshape(A, 1).astype(x.dtype)
    w2_col = w2.reshape(A, 1).astype(x.dtype)
    b2_vec = b2.reshape(1).astype(jnp.float32)

    grid = (n_pad // tm_eff,)
    out = pl.pallas_call(
        att_head_kernel,
        out_shape=jax.ShapeDtypeStruct((1, n_pad), x.dtype),
        grid_spec=pltpu.PrefetchScalarGridSpec(
            num_scalar_prefetch=0,
            grid=grid,
            in_specs=[
                pl.BlockSpec((tm_eff, D), lambda i: (i, 0)),        # x row tile
                pl.BlockSpec((A, D), lambda i: (0, 0)),             # W1 (resident)
                pl.BlockSpec((A, 1), lambda i: (0, 0)),             # b1 (resident)
                pl.BlockSpec((A, 1), lambda i: (0, 0)),             # W2^T (resident)
                pl.BlockSpec(memory_space=pltpu.MemorySpace.SMEM),  # b2 scalar
            ],
            out_specs=pl.BlockSpec((1, tm_eff), lambda i: (0, i)),  # lane-dense row
        ),
        compiler_params=pltpu.CompilerParams(
            dimension_semantics=("parallel",)),
    )(x, w1, b1_col, w2_col, b2_vec)

    return out[0, :N].reshape(N, 1)


def reference(x, w1, b1, w2, b2):
    h = jnp.maximum(x @ w1.T + b1, 0.0)
    return jax.nn.sigmoid(h @ w2.T + b2)


if __name__ == "__main__":
    FEATURE_DIM = 32
    ATT_IM_DIM = 32
    N = 16  # number of tile/patch feature vectors

    key = jax.random.PRNGKey(0)
    kx, k1, k2, k3, k4 = jax.random.split(key, 5)

    x = jax.random.normal(kx, (N, FEATURE_DIM), dtype=jnp.float32)

    # Deterministic parameter init (PyTorch-Linear-style uniform bounds, native layouts).
    bound1 = 1.0 / (FEATURE_DIM ** 0.5)
    bound2 = 1.0 / (ATT_IM_DIM ** 0.5)
    w1 = jax.random.uniform(k1, (ATT_IM_DIM, FEATURE_DIM), jnp.float32, -bound1, bound1)
    b1 = jax.random.uniform(k2, (ATT_IM_DIM,), jnp.float32, -bound1, bound1)
    w2 = jax.random.uniform(k3, (1, ATT_IM_DIM), jnp.float32, -bound2, bound2)
    b2 = jax.random.uniform(k4, (1,), jnp.float32, -bound2, bound2)

    out = att_head(x, w1, b1, w2, b2)
    out = jax.block_until_ready(out)

    ref = reference(x, w1, b1, w2, b2)
    assert out.shape == (N, 1)
    max_err = float(jnp.max(jnp.abs(out - ref)))
    assert jnp.allclose(out, ref, atol=1e-5, rtol=1e-5), max_err

    print("KERNEL_OK")
</pallas_src>

<mosaic_0001>
module attributes {stable_mosaic.version = 11 : i64} {
  func.func @att_head_kernel(%arg0: i32, %arg1: memref<128x32xf32, #tpu.memory_space<vmem>>, %arg2: memref<32x32xf32, #tpu.memory_space<vmem>>, %arg3: memref<32x1xf32, #tpu.memory_space<vmem>>, %arg4: memref<32x1xf32, #tpu.memory_space<vmem>>, %arg5: memref<1xf32, #tpu.memory_space<smem>>, %arg6: memref<1x128xf32, #tpu.memory_space<vmem>>) attributes {dimension_semantics = [#tpu.dimension_semantics<parallel>], iteration_bounds = array<i64: 1>, scalar_prefetch = 0 : i64, scratch_operands = 0 : i64, tpu.core_type = #tpu.core_type<tc>, window_params = [{transform_indices = @transform_0, window_bounds = array<i64: 128, 32>}, {pipeline_mode = #tpu.pipeline_mode<synchronous>, transform_indices = @transform_1, window_bounds = array<i64: 32, 32>}, {pipeline_mode = #tpu.pipeline_mode<synchronous>, transform_indices = @transform_2, window_bounds = array<i64: 32, 1>}, {pipeline_mode = #tpu.pipeline_mode<synchronous>, transform_indices = @transform_3, window_bounds = array<i64: 32, 1>}, {transform_indices = @transform_4, window_bounds = array<i64: 1>}, {transform_indices = @transform_5, window_bounds = array<i64: 1, 128>}]} {
    %c0 = arith.constant 0 : index
    %c0_0 = arith.constant 0 : index
    %0 = vector.load %arg2[%c0, %c0_0] : memref<32x32xf32, #tpu.memory_space<vmem>>, vector<32x32xf32>
    %c0_1 = arith.constant 0 : index
    %c0_2 = arith.constant 0 : index
    %1 = vector.load %arg1[%c0_1, %c0_2] : memref<128x32xf32, #tpu.memory_space<vmem>>, vector<128x32xf32>
    %cst = arith.constant dense<0.000000e+00> : vector<32x128xf32>
    %2 = tpu.matmul %0, %1, %cst {dimension_numbers = #tpu.dot_dimension_numbers<[1], [1], [0], [0], [0, 0, 1, 0], [], []>} : vector<32x32xf32>, vector<128x32xf32>, vector<32x128xf32> -> vector<32x128xf32>
    %c0_3 = arith.constant 0 : index
    %c0_4 = arith.constant 0 : index
    %3 = vector.load %arg3[%c0_3, %c0_4] : memref<32x1xf32, #tpu.memory_space<vmem>>, vector<32x1xf32>
    %4 = vector.broadcast %3 : vector<32x1xf32> to vector<32x128xf32>
    %5 = arith.addf %2, %4 : vector<32x128xf32>
    %cst_5 = arith.constant 0.000000e+00 : f32
    %6 = vector.broadcast %cst_5 : f32 to vector<32x128xf32>
    %7 = arith.maximumf %5, %6 : vector<32x128xf32>
    %c0_6 = arith.constant 0 : index
    %c0_7 = arith.constant 0 : index
    %8 = vector.load %arg4[%c0_6, %c0_7] : memref<32x1xf32, #tpu.memory_space<vmem>>, vector<32x1xf32>
    %9 = vector.broadcast %8 : vector<32x1xf32> to vector<32x128xf32>
    %10 = arith.mulf %7, %9 : vector<32x128xf32>
    %cst_8 = arith.constant dense<0.000000e+00> : vector<128xf32>
    %11 = vector.multi_reduction <add>, %10, %cst_8 [0] : vector<32x128xf32> to vector<128xf32>
    %12 = vector.shape_cast %11 : vector<128xf32> to vector<1x128xf32>
    %c0_9 = arith.constant 0 : index
    %13 = memref.load %arg5[%c0_9] : memref<1xf32, #tpu.memory_space<smem>>
    %14 = vector.broadcast %13 : f32 to vector<1x128xf32>
    %15 = arith.addf %12, %14 : vector<1x128xf32>
    %16 = arith.negf %15 : vector<1x128xf32>
    %17 = math.exp %16 : vector<1x128xf32>
    %cst_10 = arith.constant 1.000000e+00 : f32
    %18 = vector.broadcast %cst_10 : f32 to vector<1x128xf32>
    %19 = arith.addf %18, %17 : vector<1x128xf32>
    %20 = arith.divf %18, %19 : vector<1x128xf32>
    %c0_11 = arith.constant 0 : index
    %c0_12 = arith.constant 0 : index
    %21 = vector.load %arg6[%c0_11, %c0_12] : memref<1x128xf32, #tpu.memory_space<vmem>>, vector<1x128xf32>
    tpu.vector_store %arg6[%c0_11, %c0_12], %20 {strides = array<i32>} : memref<1x128xf32, #tpu.memory_space<vmem>>, vector<1x128xf32>,
    return
  }
  func.func @transform_0(%arg0: i32) -> (i32, i32) {
    %c0_i32 = arith.constant 0 : i32
    %c0_i32_0 = arith.constant 0 : i32
    return %arg0, %c0_i32 : i32, i32
  }
  func.func @transform_1(%arg0: i32) -> (i32, i32) {
    %c0_i32 = arith.constant 0 : i32
    %c0_i32_0 = arith.constant 0 : i32
    %c0_i32_1 = arith.constant 0 : i32
    return %c0_i32, %c0_i32_0 : i32, i32
  }
  func.func @transform_2(%arg0: i32) -> (i32, i32) {
    %c0_i32 = arith.constant 0 : i32
    %c0_i32_0 = arith.constant 0 : i32
    %c0_i32_1 = arith.constant 0 : i32
    return %c0_i32, %c0_i32_0 : i32, i32
  }
  func.func @transform_3(%arg0: i32) -> (i32, i32) {
    %c0_i32 = arith.constant 0 : i32
    %c0_i32_0 = arith.constant 0 : i32
    %c0_i32_1 = arith.constant 0 : i32
    return %c0_i32, %c0_i32_0 : i32, i32
  }
  func.func @transform_4(%arg0: i32) -> i32 {
    %c0_i32 = arith.constant 0 : i32
    %c0_i32_0 = arith.constant 0 : i32
    return %c0_i32 : i32
  }
  func.func @transform_5(%arg0: i32) -> (i32, i32) {
    %c0_i32 = arith.constant 0 : i32
    %c0_i32_0 = arith.constant 0 : i32
    return %c0_i32, %arg0 : i32, i32
  }
}

</mosaic_0001>

<bundles_post_ra>
// kernel: tpu_custom_call.1
= control target key start
LH: loop header
LB: loop body
LE: loop exit
PB: predicated region body
PF: predicated region fallthrough
CT: control target
= control target key end

     0   :  { %vm66_vm0 = vcmask 261120   ;;  %v452_v6 = vmov 0   ;;  %s657_s0 = inlined_call_operand.vmem [shape: f32[128,32], index: 0, kind: input, shape index: {}]   ;;  %s658_s1 = inlined_call_operand.vmem [shape: f32[32,32], index: 1, kind: input, shape index: {}]   ;;  %s659_s2 = inlined_call_operand.vmem [shape: f32[32,1], index: 2, kind: input, shape index: {}]   ;;  %s660_s3 = inlined_call_operand.vmem [shape: f32[32,1], index: 3, kind: input, shape index: {}]   ;;  %s661_s4 = inlined_call_operand.<no memory space> [shape: f32[1], index: 4, kind: input, shape index: {}]   ;;  %s662_s5 = inlined_call_operand.hbm [shape: f32[1,128], index: 5, kind: output, shape index: {}]  }
   0x1   :  { %v26_v0 = vld [vmem:[%s657_s0] sm:$0xff]  ;;  %v27_v1 = vld [vmem:[%s657_s0 + $0x8] sm:$0xff]  ;;  %v28_v2 = vld [vmem:[%s657_s0 + $0x10] sm:$0xff]  ;;  %422 = vset.pattern.permute.xlu0 %v452_v6  ;;  %423 = vset.pattern.permute.xlu1 %v452_v6 }
   0x2   :  { %v356_v3 = vpack.c.bf16 %v27_v1, %v26_v0  ;;  %vm495_vm1 = vmpackc.low %vm66_vm0, %vm66_vm0  ;;  %v29_v5 = vld [vmem:[%s657_s0 + $0x18] sm:$0xff]  ;;  %v22_v8 = vld [vmem:[%s658_s1] sm:$0xff] }
   0x3   :  { %v362_v7 = vpack.c.bf16 %v29_v5, %v28_v2  ;;  %v30_v9 = vld [vmem:[%s657_s0 + $0x20] sm:$0xff]  ;;  %v31_v10 = vld [vmem:[%s657_s0 + $0x28] sm:$0xff]  ;;  %350 = vmatprep.mubr.msk.f32.mxu0 %vm66_vm0, %v22_v8  ;;  %v24_v11 = vld [vmem:[%s658_s1 + $0x10] sm:$0xff] }
   0x4   :  { %358 = vmatprep.subr.msk.bf16.mxu0 %vm495_vm1, %v356_v3  ;;  %404 = vmatprep.subr.msk.bf16.mxu1 %vm495_vm1, %v356_v3  ;;  %v42_v12 = vld [vmem:[%s659_s2] sm:$0xff]  ;;  %v44_v13 = vld [vmem:[%s659_s2 + $0x10] sm:$0xff]  ;;  %v368_v14 = vpack.c.bf16 %v31_v10, %v30_v9 }
   0x5   :  { %361 = vmatpush3.bf16.xpose.msk.msra.mxu0 %vm495_vm1, %v356_v3  ;;  %412 = vmatpush3.bf16.xpose.msk.msra.mxu1 %vm495_vm1, %v356_v3 }
   0x6   :  { %364 = vmatprep.subr.msk.bf16.mxu0 %vm495_vm1, %v362_v7  ;;  %405 = vmatprep.subr.msk.bf16.mxu1 %vm495_vm1, %v362_v7 }
   0x7   :  { %353 = vmatprep.mubr.msk.f32.mxu1 %vm66_vm0, %v24_v11  ;;  %48 = vperm.xlu0 %422, %v42_v12  }
   0x8   :  { %58 = vperm.xlu1 %423, %v44_v13  }
   0x9   :  { %11 = vsyncpa [#allocation4], 0  ;;  %v43_v15 = vld [vmem:[%s659_s2 + $0x8] sm:$0xff]  ;;  %v45_v16 = vld [vmem:[%s659_s2 + $0x18] sm:$0xff]  ;;  %v254_v6 = vstv %s661_s4  ;;  %s453_s21 = smov [#allocation3]  }
   0xa   :  { %v32_v17 = vld [vmem:[%s657_s0 + $0x30] sm:$0xff]  ;;  %v33_v18 = vld [vmem:[%s657_s0 + $0x38] sm:$0xff]  ;;  %v216_v19 = vld [vmem:[%s660_s3] sm:$0xff]  ;;  %s269_s22 = sshll.u32 %s453_s21, 4  ;;  %s270_s22 = int_to_ptr.vmem [resolvable:$true] %s269_s22 }
   0xb   :  { %53 = vperm.xlu0 %422, %v43_v15   ;;  %v217_v20 = vld [vmem:[%s660_s3 + $0x8] sm:$0xff]  ;;  %v374_v21 = vpack.c.bf16 %v33_v18, %v32_v17  ;;  %v218_v22 = vld [vmem:[%s660_s3 + $0x10] sm:$0xff]  ;;  %v219_v23 = vld [vmem:[%s660_s3 + $0x18] sm:$0xff]  ;;  %s428_s23 = scalar_lea.vmem %s270_s22, 16  ;;  %s432_s24 = scalar_lea.vmem %s270_s22, 32 }
   0xc   :  { %63 = vperm.xlu1 %423, %v45_v16   ;;  %v34_v24 = vld [vmem:[%s657_s0 + $0x40] sm:$0xff]  ;;  %v35_v25 = vld [vmem:[%s657_s0 + $0x48] sm:$0xff]  ;;  %v36_v27 = vld [vmem:[%s657_s0 + $0x50] sm:$0xff]  ;;  %p429_p0 = scmp.ne.s32.totalorder %s270_s22, %s428_s23  ;;  %p433_p1 = scmp.lt.s32.totalorder %s270_s22, %s270_s22 }
   0xd   :  { %367 = vmatpush3.bf16.xpose.msk.msra.mxu0 %vm495_vm1, %v362_v7  ;;  %413 = vmatpush3.bf16.xpose.msk.msra.mxu1 %vm495_vm1, %v362_v7  ;;  %v380_v26 = vpack.c.bf16 %v35_v25, %v34_v24  ;;  %v37_v28 = vld [vmem:[%s657_s0 + $0x58] sm:$0xff]  ;;  %v38_v30 = vld [vmem:[%s657_s0 + $0x60] sm:$0xff]  ;;  %v39_v31 = vld [vmem:[%s657_s0 + $0x68] sm:$0xff]  ;;  %p434_p2 = scmp.lt.s32.totalorder %s432_s24, %s428_s23 }
   0xe   :  { %370 = vmatprep.subr.msk.bf16.mxu0 %vm495_vm1, %v368_v14  ;;  %406 = vmatprep.subr.msk.bf16.mxu1 %vm495_vm1, %v368_v14  ;;  %v386_v29 = vpack.c.bf16 %v37_v28, %v36_v27  ;;  %v392_v32 = vpack.c.bf16 %v39_v31, %v38_v30  ;;  %v40_v33 = vld [vmem:[%s657_s0 + $0x70] sm:$0xff]  ;;  %v41_v34 = vld [vmem:[%s657_s0 + $0x78] sm:$0xff]  ;;  %v23_v36 = vld [vmem:[%s658_s1 + $0x8] sm:$0xff] }
   0xf   :  { %222 = vperm.xlu0 %422, %v216_v19   ;;  %v398_v35 = vpack.c.bf16 %v41_v34, %v40_v33  ;;  %v25_v37 = vld [vmem:[%s658_s1 + $0x18] sm:$0xff]  ;;  %p435_p3 = por %p434_p2, %p433_p1 }
  0x10   :  { %227 = vperm.xlu1 %423, %v217_v20  }
  0x11   :  { %p436_p4 = pnand %p435_p3, %p429_p0 }
  0x13   :  { %232 = vperm.xlu0 %422, %v218_v22  }
  0x14   :  { %237 = vperm.xlu1 %423, %v219_v23  }
  0x15   :  { %373 = vmatpush3.bf16.xpose.msk.msra.mxu0 %vm495_vm1, %v368_v14  ;;  %414 = vmatpush3.bf16.xpose.msk.msra.mxu1 %vm495_vm1, %v368_v14 }
  0x16   :  { %376 = vmatprep.subr.msk.bf16.mxu0 %vm495_vm1, %v374_v21  ;;  %407 = vmatprep.subr.msk.bf16.mxu1 %vm495_vm1, %v374_v21 }
  0x1d   :  { %379 = vmatpush3.bf16.xpose.msk.msra.mxu0 %vm495_vm1, %v374_v21  ;;  %415 = vmatpush3.bf16.xpose.msk.msra.mxu1 %vm495_vm1, %v374_v21 }
  0x1e   :  { %382 = vmatprep.subr.msk.bf16.mxu0 %vm495_vm1, %v380_v26  ;;  %408 = vmatprep.subr.msk.bf16.mxu1 %vm495_vm1, %v380_v26 }
  0x25   :  { %385 = vmatpush3.bf16.xpose.msk.msra.mxu0 %vm495_vm1, %v380_v26  ;;  %416 = vmatpush3.bf16.xpose.msk.msra.mxu1 %vm495_vm1, %v380_v26 }
  0x26   :  { %388 = vmatprep.subr.msk.bf16.mxu0 %vm495_vm1, %v386_v29  ;;  %409 = vmatprep.subr.msk.bf16.mxu1 %vm495_vm1, %v386_v29 }
  0x2d   :  { %391 = vmatpush3.bf16.xpose.msk.msra.mxu0 %vm495_vm1, %v386_v29  ;;  %417 = vmatpush3.bf16.xpose.msk.msra.mxu1 %vm495_vm1, %v386_v29 }
  0x2e   :  { %394 = vmatprep.subr.msk.bf16.mxu0 %vm495_vm1, %v392_v32  ;;  %410 = vmatprep.subr.msk.bf16.mxu1 %vm495_vm1, %v392_v32 }
  0x35   :  { %397 = vmatpush3.bf16.xpose.msk.msra.mxu0 %vm495_vm1, %v392_v32  ;;  %418 = vmatpush3.bf16.xpose.msk.msra.mxu1 %vm495_vm1, %v392_v32 }
  0x36   :  { %400 = vmatprep.subr.msk.bf16.mxu0 %vm495_vm1, %v398_v35  ;;  %411 = vmatprep.subr.msk.bf16.mxu1 %vm495_vm1, %v398_v35 }
  0x3d   :  { %403 = vmatpush3.bf16.xpose.msk.msra.mxu0 %vm495_vm1, %v398_v35  ;;  %419 = vmatpush3.bf16.xpose.msk.msra.mxu1 %vm495_vm1, %v398_v35 }
  0x44   :  { %351 = vmatmul.mubr.msk.f32.vlgmr.msra.gmra.mrb[0].mxu0 %vm66_vm0, %v23_v36  ;;  %354 = vmatmul.mubr.msk.f32.vlgmr.msra.gmra.mrb[0].mxu1 %vm66_vm0, %v25_v37 }
  0x86   :  { %v49_v38 = vpop.permute.xlu0 %48 }
  0x87   :  { %v59_v39 = vpop.permute.xlu1 %58 }
  0x8a   :  { %v54_v40 = vpop.permute.xlu0 %53 }
  0x8b   :  { %v64_v41 = vpop.permute.xlu1 %63 }
  0x8e   :  { %v223_v42 = vpop.permute.xlu0 %222 }
  0x8f   :  { %v228_v51 = vpop.permute.xlu1 %227 }
  0x92   :  { %v233_v58 = vpop.permute.xlu0 %232 }
  0x93   :  { %v238_v61 = vpop.permute.xlu1 %237 }
 0x117   :  { %v352_v43 = vpop.f32.mrb[0].mxu0  ;;  %v355_v44 = vpop.f32.mrb[0].mxu1 }
 0x118   :  { %v199_v45 = vadd.f32 %v352_v43, %v54_v40  ;;  %v193_v46 = vpop.f32.mrb[1].mxu0  ;;  %v203_v47 = vpop.f32.mrb[1].mxu1  ;;  %v209_v48 = vadd.f32 %v355_v44, %v64_v41 }
 0x119   :  { %v194_v49 = vadd.f32 %v193_v46, %v49_v38  ;;  %v204_v50 = vadd.f32 %v203_v47, %v59_v39 }
 0x11a   :  { %v213_v52 = vmax.f32 %v199_v45, 0.0  ;;  %v215_v56 = vmax.f32 %v209_v48, 0.0 }
 0x11b   :  { %v212_v53 = vmax.f32 %v194_v49, 0.0  ;;  %v214_v54 = vmax.f32 %v204_v50, 0.0 }
 0x11c   :  { %v241_v55 = vmul.f32 %v228_v51, %v213_v52  ;;  %v243_v62 = vmul.f32 %v238_v61, %v215_v56 }
 0x11d   :  { %v240_v57 = vmul.f32 %v223_v42, %v212_v53  ;;  %v242_v60 = vmul.f32 %v233_v58, %v214_v54 }
 0x11f   :  { %v244_v59 = vadd.f32 %v241_v55, %v240_v57 }
 0x121   :  { %v245_v63 = vadd.f32 %v244_v59, %v242_v60 }
 0x123   :  { %v246_v0 = vadd.f32 %v245_v63, %v243_v62 }
 0x125   :  { %v247_v1 = vrot.slane %v246_v0, 4 }
 0x127   :  { %v248_v2 = vadd.f32 %v247_v1, %v246_v0 }
 0x129   :  { %v249_v3 = vrot.slane %v248_v2, 2 }
 0x12b   :  { %v250_v4 = vadd.f32 %v249_v3, %v248_v2 }
 0x12d   :  { %v251_v5 = vrot.slane %v250_v4, 1 }
 0x12f   :  { %v252_v7 = vadd.f32 %v251_v5, %v250_v4 }
 0x131   :  { %v255_v8 = vadd.f32 %v254_v6, %v252_v7 }
 0x133   :  { %v297_v9 = vmul.f32 -1.442695, %v255_v8 }
 0x135   :  { %424 = vpow2.f32 %v297_v9 }
 0x13f   :  { %v425_v10 = vpop.eup %424 }
 0x140   :  { %v259_v11 = vadd.f32 1.0, %v425_v10 }
 0x142   :  { %426 = vrcp.f32 %v259_v11 }
 0x14c   :  { %v427_v12 = vpop.eup %426 }
 0x14d   :  { %262 = vst [vmem:[#allocation3] sm:$0x1] %v427_v12 }
 0x14e   :  { %439 = shalt.err (!%p436_p4)
}
 0x14f   :  { %s440_s26 = scalar_lea.hbm %s662_s5, 16 }
 0x150   :  { %p441_p5 = scmp.ne.s32.totalorder %s662_s5, %s440_s26  ;;  %p444_p6 = scmp.lt.u32.totalorder %s440_s26, %s662_s5 }
 0x152   :  { %p446_p7 = pnand %p444_p6, %p441_p5 }
 0x154   :  { %449 = shalt.err (!%p446_p7)
}
 0x155   :  { %272 = dma.vmem_to_hbm [thread:$0]  %s270_s22, 16, %s662_s5, [#allocation4]  }
 0x156   :  { %450 = dma.done.wait [#allocation4], 16  }
 0x157   :  { %451 = vsyncadd [#allocation4], 4294967280 }
 0x158   :  { %276 = vsyncpa [#allocation4], 1 }

</bundles_post_ra>
